<compile_context>
chip_gen: v6e
topology: v6e:2x2x1
jax: 0.10.0
libtpu: 0.0.40
codegen_flags: <defaults>
</compile_context>

<pallas_src>
import jax
import jax.numpy as jnp
from jax.experimental import pallas as pl
from jax.experimental.pallas import tpu as pltpu

FEAT_STR = 4        # x[:, :4]
FEAT_ELE = 54       # x[:, 4:]
FEAT = FEAT_STR + FEAT_ELE          # 58
LATENT = 10
HID = 20                            # per-encoder output width (mu | logvar)
H_CAT = 2 * HID                     # 40  (fused encoder width)
EPS_CAT = 2 * LATENT                # 20  (eps1 | eps2)
PACK = H_CAT + EPS_CAT + 1          # 61 useful output lanes: [h | z | predict]


# --------------------------------------------------------------------------
# Kernel
# --------------------------------------------------------------------------
def network_kernel(x_ref, eps_ref, w1_ref, w2_ref, b12_ref, fcw_ref, fcb_ref,
                   out_ref):
    x = x_ref[...]                                              # [TB, 58]

    # fused (block-diagonal) encoders: both encoder stacks in two MXU passes
    a = jnp.maximum(
        jnp.dot(x, w1_ref[...], preferred_element_type=jnp.float32)
        + b12_ref[0:1, :], 0.0)                                 # [TB, 40] = [a1|a2]
    h = (jnp.dot(a, w2_ref[...], preferred_element_type=jnp.float32)
         + b12_ref[1:2, :])                                     # [TB, 40] = [mu1|mu2|lv1|lv2]

    # permuted column layout -> mu / logvar / z are contiguous 20-lane slices
    mu = h[:, :EPS_CAT]                                         # [TB, 20] = [mu1|mu2]
    logvar = h[:, EPS_CAT:]                                     # [TB, 20] = [lv1|lv2]
    z = mu + jnp.exp(0.5 * logvar) * eps_ref[...]               # [TB, 20] = [z1|z2]

    # fc head directly on the contiguous latent slice (no concat needed)
    predict = (jnp.dot(z, fcw_ref[...], preferred_element_type=jnp.float32)
               + fcb_ref[0])                                    # [TB, 1]

    # lane-dense packed output: [h | z | predict | pad]; h is already at lane 0
    pad = jnp.zeros((x.shape[0], out_ref.shape[1] - PACK), jnp.float32)
    out_ref[...] = jnp.concatenate([h, z, predict, pad], axis=1)


# --------------------------------------------------------------------------
# Host-side parameter fusion
# --------------------------------------------------------------------------
def _block_diag(a, b):
    out = jnp.zeros((a.shape[0] + b.shape[0], a.shape[1] + b.shape[1]), a.dtype)
    out = out.at[:a.shape[0], :a.shape[1]].set(a)
    out = out.at[a.shape[0]:, a.shape[1]:].set(b)
    return out


# column permutation [mu1|lv1|mu2|lv2] -> [mu1|mu2|lv1|lv2]
_COL_PERM = tuple(list(range(0, LATENT))
                  + list(range(HID, HID + LATENT))
                  + list(range(LATENT, HID))
                  + list(range(HID + LATENT, 2 * HID)))


def fuse_params(kernel_params):
    """Block-diagonal fused encoder weights, with permuted W2/b2 columns."""
    (e1w1, e1b1, e1w2, e1b2, e2w1, e2b1, e2w2, e2b2, fcw, fcb) = kernel_params
    perm = jnp.asarray(_COL_PERM)
    w1 = _block_diag(e1w1, e2w1)                                 # [58, 40]
    b1 = jnp.concatenate([e1b1, e2b1], axis=1)                   # [1, 40]
    w2 = _block_diag(e1w2, e2w2)[:, perm]                        # [40, 40]
    b2 = jnp.concatenate([e1b2, e2b2], axis=1)[:, perm]          # [1, 40]
    b12 = jnp.concatenate([b1, b2], axis=0)                      # [2, 40]
    return w1, w2, b12, fcw, fcb.reshape((1,))                   # fcb -> SMEM scalar


# --------------------------------------------------------------------------
# Wrapper
# --------------------------------------------------------------------------
def _round_up(v, m):
    return -(-v // m) * m


def _choose_batch_tile(B, block_b):
    """Minimize padding; force >=2 grid steps on big batches (v7x megacore)."""
    steps = pl.cdiv(B, block_b)
    if B >= 512:
        steps = max(steps, 2)
    return min(block_b, _round_up(pl.cdiv(B, steps), 8))


def _default_out_lanes():
    # 64-lane packed output (PACK=61 fits, block == full last dim so legal)
    # halves writeback bytes; most valuable on v5e.  128 (unmasked vst) else.
    try:
        kind = jax.devices()[0].device_kind.lower()
    except Exception:
        return 128
    return 64 if ("v5 lite" in kind or "v5e" in kind) else 128


def network_forward(x, eps, fused_params, *, block_b=2048, out_lanes=None):
    """x: [B, 58], eps: [B, 20] = [eps1 | eps2] standard-normal draws."""
    B = x.shape[0]
    w1, w2, b12, fcw, fcb = fused_params
    if out_lanes is None:
        out_lanes = _default_out_lanes()

    tb = _choose_batch_tile(B, block_b)
    b_pad = _round_up(B, tb)
    if b_pad != B:
        x_p = jnp.pad(x, ((0, b_pad - B), (0, 0)))
        eps_p = jnp.pad(eps, ((0, b_pad - B), (0, 0)))
    else:
        x_p, eps_p = x, eps

    grid = (b_pad // tb,)
    flops = 2 * b_pad * (FEAT * H_CAT + H_CAT * H_CAT + EPS_CAT * 1)
    bytes_accessed = 4 * (b_pad * (FEAT + EPS_CAT + out_lanes)
                          + FEAT * H_CAT + H_CAT * H_CAT + 2 * H_CAT
                          + EPS_CAT + 1)

    # explicit VMEM budget: double-buffered I/O tiles + lane-padded temporaries
    # + weights + headroom (v5e's scoped default is only 16 MiB).
    io = 2 * 4 * tb * (FEAT + EPS_CAT + out_lanes)
    interm = 8 * 4 * tb * 128
    wbytes = 2 * 4 * (FEAT * H_CAT + H_CAT * H_CAT + 2 * H_CAT + EPS_CAT)
    vmem_limit = min(max(int(1.25 * (io + interm + wbytes)) + (2 << 20),
                         16 << 20), 48 << 20)

    out = pl.pallas_call(
        network_kernel,
        out_shape=jax.ShapeDtypeStruct((b_pad, out_lanes), jnp.float32),
        grid=grid,
        in_specs=[
            pl.BlockSpec((tb, FEAT), lambda i: (i, 0)),          # x
            pl.BlockSpec((tb, EPS_CAT), lambda i: (i, 0)),       # eps
            pl.BlockSpec((FEAT, H_CAT), lambda i: (0, 0)),       # W1 (block-diag)
            pl.BlockSpec((H_CAT, H_CAT), lambda i: (0, 0)),      # W2 (block-diag, permuted)
            pl.BlockSpec((2, H_CAT), lambda i: (0, 0)),          # [b1 ; b2]
            pl.BlockSpec((EPS_CAT, 1), lambda i: (0, 0)),        # fc W
            pl.BlockSpec(memory_space=pltpu.MemorySpace.SMEM),   # fc b (scalar)
        ],
        out_specs=pl.BlockSpec((tb, out_lanes), lambda i: (i, 0)),
        compiler_params=pltpu.CompilerParams(
            dimension_semantics=("parallel",),                   # megacore sharding
            vmem_limit_bytes=vmem_limit),
        cost_estimate=pl.CostEstimate(
            flops=flops,
            transcendentals=b_pad * EPS_CAT,
            bytes_accessed=bytes_accessed),
    )(x_p, eps_p, w1, w2, b12, fcw, fcb)

    # unpack: out = [mu1|mu2|lv1|lv2 | z1|z2 | predict | pad]
    h_perm = out[:B, :H_CAT]
    h1 = jnp.concatenate([h_perm[:, :LATENT], h_perm[:, HID:HID + LATENT]], axis=1)
    h2 = jnp.concatenate([h_perm[:, LATENT:HID], h_perm[:, HID + LATENT:]], axis=1)
    z1 = out[:B, H_CAT:H_CAT + LATENT]
    z2 = out[:B, H_CAT + LATENT:H_CAT + EPS_CAT]
    predict = out[:B, H_CAT + EPS_CAT:PACK]
    # x_str / x_ele are pure slices of the input -> produced in the wrapper
    x_str = x[:, :FEAT_STR]
    x_ele = x[:, FEAT_STR:]
    return predict, z1, z2, h1, h2, x_str, x_ele


# --------------------------------------------------------------------------
# Parameter init (PyTorch-style) + reference
# --------------------------------------------------------------------------
def init_linear(key, fan_in, fan_out):
    """PyTorch-style uniform(+-1/sqrt(fan_in)) init. W stored as [in, out]."""
    kw, kb = jax.random.split(key)
    bound = 1.0 / float(fan_in) ** 0.5
    w = jax.random.uniform(kw, (fan_in, fan_out), jnp.float32, -bound, bound)
    b = jax.random.uniform(kb, (1, fan_out), jnp.float32, -bound, bound)
    return w, b


def init_params(key):
    ks = jax.random.split(key, 5)
    e1w1, e1b1 = init_linear(ks[0], 4, 5)
    e1w2, e1b2 = init_linear(ks[1], 5, 20)
    e2w1, e2b1 = init_linear(ks[2], 54, 35)
    e2w2, e2b2 = init_linear(ks[3], 35, 20)
    fcw, fcb = init_linear(ks[4], 20, 1)
    # TODO(synk): decoder1/decoder2 (recon_x1/2, simu_x) and KLD are computed
    # by the PyTorch forward but never returned -> dead code, not implemented.
    return (e1w1, e1b1, e1w2, e1b2,
            e2w1, e2b1, e2w2, e2b2,
            fcw, fcb)


def ref_forward(x, eps, p):
    """Pure-JAX reference with the ORIGINAL (unfused) params."""
    (e1w1, e1b1, e1w2, e1b2, e2w1, e2b1, e2w2, e2b2, fcw, fcb) = p
    eps1, eps2 = eps[:, :LATENT], eps[:, LATENT:]
    xs, xe = x[:, :FEAT_STR], x[:, FEAT_STR:]
    h1 = jnp.maximum(xs @ e1w1 + e1b1, 0.0) @ e1w2 + e1b2
    z1 = h1[:, :LATENT] + jnp.exp(0.5 * h1[:, LATENT:]) * eps1
    h2 = jnp.maximum(xe @ e2w1 + e2b1, 0.0) @ e2w2 + e2b2
    z2 = h2[:, :LATENT] + jnp.exp(0.5 * h2[:, LATENT:]) * eps2
    pred = jnp.concatenate([z1, z2], axis=1) @ fcw + fcb
    return pred, z1, z2, h1, h2, xs, xe


if __name__ == "__main__":
    key = jax.random.PRNGKey(0)
    k_param, k_x, k_eps, k_x2, k_eps2 = jax.random.split(key, 5)

    params = init_params(k_param)
    fused = fuse_params(params)

    # small run (no padding path)
    B = 8
    x = jax.random.normal(k_x, (B, FEAT), jnp.float32)
    eps = jax.random.normal(k_eps, (B, EPS_CAT), jnp.float32)   # [eps1 | eps2]

    outs = jax.block_until_ready(network_forward(x, eps, fused))
    predict, z1, z2, h1, h2, x_str, x_ele = outs
    assert predict.shape == (B, 1)
    assert z1.shape == (B, LATENT) and z2.shape == (B, LATENT)
    assert h1.shape == (B, HID) and h2.shape == (B, HID)
    assert x_str.shape == (B, FEAT_STR) and x_ele.shape == (B, FEAT_ELE)

    refs = ref_forward(x, eps, params)   # also validates block-diag + permutation
    for got, want in zip(outs, refs):
        assert jnp.allclose(got, want, atol=1e-5, rtol=1e-5)

    # second run with B not a tile multiple (exercises padding + tile choice)
    B2 = 10
    x2 = jax.random.normal(k_x2, (B2, FEAT), jnp.float32)
    eps2 = jax.random.normal(k_eps2, (B2, EPS_CAT), jnp.float32)
    outs2 = jax.block_until_ready(network_forward(x2, eps2, fused))
    refs2 = ref_forward(x2, eps2, params)
    for got, want in zip(outs2, refs2):
        assert got.shape == want.shape
        assert jnp.allclose(got, want, atol=1e-5, rtol=1e-5)

    print("KERNEL_OK")
</pallas_src>

<mosaic_0001>
module attributes {stable_mosaic.version = 11 : i64} {
  func.func @network_kernel(%arg0: i32, %arg1: memref<8x58xf32, #tpu.memory_space<vmem>>, %arg2: memref<8x20xf32, #tpu.memory_space<vmem>>, %arg3: memref<58x40xf32, #tpu.memory_space<vmem>>, %arg4: memref<40x40xf32, #tpu.memory_space<vmem>>, %arg5: memref<2x40xf32, #tpu.memory_space<vmem>>, %arg6: memref<20x1xf32, #tpu.memory_space<vmem>>, %arg7: memref<1xf32, #tpu.memory_space<smem>>, %arg8: memref<8x128xf32, #tpu.memory_space<vmem>>) attributes {dimension_semantics = [#tpu.dimension_semantics<parallel>], iteration_bounds = array<i64: 1>, scalar_prefetch = 0 : i64, scratch_operands = 0 : i64, tpu.core_type = #tpu.core_type<tc>, window_params = [{transform_indices = @transform_0, window_bounds = array<i64: 8, 58>}, {transform_indices = @transform_1, window_bounds = array<i64: 8, 20>}, {pipeline_mode = #tpu.pipeline_mode<synchronous>, transform_indices = @transform_2, window_bounds = array<i64: 58, 40>}, {pipeline_mode = #tpu.pipeline_mode<synchronous>, transform_indices = @transform_3, window_bounds = array<i64: 40, 40>}, {pipeline_mode = #tpu.pipeline_mode<synchronous>, transform_indices = @transform_4, window_bounds = array<i64: 2, 40>}, {pipeline_mode = #tpu.pipeline_mode<synchronous>, transform_indices = @transform_5, window_bounds = array<i64: 20, 1>}, {transform_indices = @transform_6, window_bounds = array<i64: 1>}, {transform_indices = @transform_7, window_bounds = array<i64: 8, 128>}]} {
    %c0 = arith.constant 0 : index
    %c0_0 = arith.constant 0 : index
    %0 = vector.load %arg1[%c0, %c0_0] : memref<8x58xf32, #tpu.memory_space<vmem>>, vector<8x58xf32>
    %c0_1 = arith.constant 0 : index
    %c0_2 = arith.constant 0 : index
    %1 = vector.load %arg3[%c0_1, %c0_2] : memref<58x40xf32, #tpu.memory_space<vmem>>, vector<58x40xf32>
    %cst = arith.constant dense<0.000000e+00> : vector<8x40xf32>
    %2 = tpu.matmul %0, %1, %cst {dimension_numbers = #tpu.dot_dimension_numbers<[1], [0], [0], [1], [0, 0, 1, 1], [], []>} : vector<8x58xf32>, vector<58x40xf32>, vector<8x40xf32> -> vector<8x40xf32>
    %c0_3 = arith.constant 0 : index
    %c0_4 = arith.constant 0 : index
    %3 = vector.load %arg5[%c0_3, %c0_4] : memref<2x40xf32, #tpu.memory_space<vmem>>, vector<1x40xf32>
    %4 = vector.broadcast %3 : vector<1x40xf32> to vector<8x40xf32>
    %5 = arith.addf %2, %4 : vector<8x40xf32>
    %cst_5 = arith.constant 0.000000e+00 : f32
    %6 = vector.broadcast %cst_5 : f32 to vector<8x40xf32>
    %7 = arith.maximumf %5, %6 : vector<8x40xf32>
    %c0_6 = arith.constant 0 : index
    %c0_7 = arith.constant 0 : index
    %8 = vector.load %arg4[%c0_6, %c0_7] : memref<40x40xf32, #tpu.memory_space<vmem>>, vector<40x40xf32>
    %cst_8 = arith.constant dense<0.000000e+00> : vector<8x40xf32>
    %9 = tpu.matmul %7, %8, %cst_8 {dimension_numbers = #tpu.dot_dimension_numbers<[1], [0], [0], [1], [0, 0, 1, 1], [], []>} : vector<8x40xf32>, vector<40x40xf32>, vector<8x40xf32> -> vector<8x40xf32>
    %c1 = arith.constant 1 : index
    %c0_9 = arith.constant 0 : index
    %10 = vector.load %arg5[%c1, %c0_9] : memref<2x40xf32, #tpu.memory_space<vmem>>, vector<1x40xf32>
    %11 = vector.broadcast %10 : vector<1x40xf32> to vector<8x40xf32>
    %12 = arith.addf %9, %11 : vector<8x40xf32>
    %13 = vector.extract_strided_slice %12 {offsets = [0, 0], sizes = [8, 20], strides = [1, 1]} : vector<8x40xf32> to vector<8x20xf32>
    %14 = vector.extract_strided_slice %12 {offsets = [0, 20], sizes = [8, 20], strides = [1, 1]} : vector<8x40xf32> to vector<8x20xf32>
    %cst_10 = arith.constant 5.000000e-01 : f32
    %15 = vector.broadcast %cst_10 : f32 to vector<8x20xf32>
    %16 = arith.mulf %15, %14 : vector<8x20xf32>
    %17 = math.exp %16 : vector<8x20xf32>
    %c0_11 = arith.constant 0 : index
    %c0_12 = arith.constant 0 : index
    %18 = vector.load %arg2[%c0_11, %c0_12] : memref<8x20xf32, #tpu.memory_space<vmem>>, vector<8x20xf32>
    %19 = arith.mulf %17, %18 : vector<8x20xf32>
    %20 = arith.addf %13, %19 : vector<8x20xf32>
    %c0_13 = arith.constant 0 : index
    %c0_14 = arith.constant 0 : index
    %21 = vector.load %arg6[%c0_13, %c0_14] : memref<20x1xf32, #tpu.memory_space<vmem>>, vector<20x1xf32>
    %cst_15 = arith.constant dense<0.000000e+00> : vector<8x1xf32>
    %22 = tpu.matmul %20, %21, %cst_15 {dimension_numbers = #tpu.dot_dimension_numbers<[1], [0], [0], [1], [0, 0, 1, 1], [], []>} : vector<8x20xf32>, vector<20x1xf32>, vector<8x1xf32> -> vector<8x1xf32>
    %c0_16 = arith.constant 0 : index
    %23 = memref.load %arg7[%c0_16] : memref<1xf32, #tpu.memory_space<smem>>
    %24 = vector.broadcast %23 : f32 to vector<8x1xf32>
    %25 = arith.addf %22, %24 : vector<8x1xf32>
    %cst_17 = arith.constant 0.000000e+00 : f32
    %26 = vector.broadcast %cst_17 : f32 to vector<8x67xf32>
    %27 = tpu.concatenate %12, %20, %25, %26 in 1 : vector<8x40xf32>, vector<8x20xf32>, vector<8x1xf32>, vector<8x67xf32> -> vector<8x128xf32>
    %c0_18 = arith.constant 0 : index
    %c0_19 = arith.constant 0 : index
    %28 = vector.load %arg8[%c0_18, %c0_19] : memref<8x128xf32, #tpu.memory_space<vmem>>, vector<8x128xf32>
    tpu.vector_store %arg8[%c0_18, %c0_19], %27 {strides = array<i32>} : memref<8x128xf32, #tpu.memory_space<vmem>>, vector<8x128xf32>,
    return
  }
  func.func @transform_0(%arg0: i32) -> (i32, i32) {
    %c0_i32 = arith.constant 0 : i32
    %c0_i32_0 = arith.constant 0 : i32
    return %arg0, %c0_i32 : i32, i32
  }
  func.func @transform_1(%arg0: i32) -> (i32, i32) {
    %c0_i32 = arith.constant 0 : i32
    %c0_i32_0 = arith.constant 0 : i32
    return %arg0, %c0_i32 : i32, i32
  }
  func.func @transform_2(%arg0: i32) -> (i32, i32) {
    %c0_i32 = arith.constant 0 : i32
    %c0_i32_0 = arith.constant 0 : i32
    %c0_i32_1 = arith.constant 0 : i32
    return %c0_i32, %c0_i32_0 : i32, i32
  }
  func.func @transform_3(%arg0: i32) -> (i32, i32) {
    %c0_i32 = arith.constant 0 : i32
    %c0_i32_0 = arith.constant 0 : i32
    %c0_i32_1 = arith.constant 0 : i32
    return %c0_i32, %c0_i32_0 : i32, i32
  }
  func.func @transform_4(%arg0: i32) -> (i32, i32) {
    %c0_i32 = arith.constant 0 : i32
    %c0_i32_0 = arith.constant 0 : i32
    %c0_i32_1 = arith.constant 0 : i32
    return %c0_i32, %c0_i32_0 : i32, i32
  }
  func.func @transform_5(%arg0: i32) -> (i32, i32) {
    %c0_i32 = arith.constant 0 : i32
    %c0_i32_0 = arith.constant 0 : i32
    %c0_i32_1 = arith.constant 0 : i32
    return %c0_i32, %c0_i32_0 : i32, i32
  }
  func.func @transform_6(%arg0: i32) -> i32 {
    %c0_i32 = arith.constant 0 : i32
    %c0_i32_0 = arith.constant 0 : i32
    return %c0_i32 : i32
  }
  func.func @transform_7(%arg0: i32) -> (i32, i32) {
    %c0_i32 = arith.constant 0 : i32
    %c0_i32_0 = arith.constant 0 : i32
    return %arg0, %c0_i32 : i32, i32
  }
}

</mosaic_0001>

<bundles_post_ra>
// kernel: tpu_custom_call.1
= control target key start
LH: loop header
LB: loop body
LE: loop exit
PB: predicated region body
PF: predicated region fallthrough
CT: control target
= control target key end

     0   :  { %vm46_vm0 = vcmask 1041408   ;;  %v427_v1 = vmov 0.0   ;;  %vm428_vm1 = vmmov 0   ;;  %s564_s0 = inlined_call_operand.vmem [shape: f32[8,58], index: 0, kind: input, shape index: {}]   ;;  %s565_s1 = inlined_call_operand.vmem [shape: f32[8,20], index: 1, kind: input, shape index: {}]   ;;  %s566_s2 = inlined_call_operand.vmem [shape: f32[58,40], index: 2, kind: input, shape index: {}]   ;;  %s567_s3 = inlined_call_operand.vmem [shape: f32[40,40], index: 3, kind: input, shape index: {}]   ;;  %s568_s4 = inlined_call_operand.vmem [shape: f32[2,40], index: 4, kind: input, shape index: {}]   ;;  %s569_s5 = inlined_call_operand.vmem [shape: f32[20,1], index: 5, kind: input, shape index: {}]   ;;  %s570_s6 = inlined_call_operand.<no memory space> [shape: f32[1], index: 6, kind: input, shape index: {}]   ;;  %s571_s7 = inlined_call_operand.hbm [shape: f32[8,128], index: 7, kind: output, shape index: {}]  }
   0x1   :  { %v36_v0 = vld [vmem:[%s566_s2 + $0x38] sm:$0x3]  ;;  %355 = vmatprep.subr.mxu0 %v427_v1  ;;  %v35_v2 = vld [vmem:[%s566_s2 + $0x30] sm:$0xff]  ;;  %374 = vmatprep.subr.mxu1 %v427_v1  ;;  %v34_v3 = vld [vmem:[%s566_s2 + $0x28] sm:$0xff] }
   0x2   :  { %356 = vmatpush3.msk.msra.mxu0 %vm46_vm0, %v36_v0  ;;  %371 = vmatprep.mubr.msk.f32.mxu0 %vm428_vm1, %v427_v1  ;;  %v125_v4 = vld [vmem:[%s567_s3 + $0x20] sm:$0xff]  ;;  %v124_v5 = vld [vmem:[%s567_s3 + $0x18] sm:$0xff] }
   0x3   :  { %357 = vmatprep.subr.mxu0 %v427_v1  ;;  %384 = vmatprep.mubr.msk.f32.mxu1 %vm428_vm1, %v427_v1 }
   0x4   :  { %358 = vmatpush3.msra.mxu0 %v35_v2  ;;  %375 = vmatpush3.msra.mxu1 %v125_v4 }
   0x5   :  { %13 = vsyncpa [#allocation4], 0  ;;  %359 = vmatprep.subr.mxu0 %v427_v1  ;;  %v33_v6 = vld [vmem:[%s566_s2 + $0x20] sm:$0xff]  ;;  %376 = vmatprep.subr.mxu1 %v427_v1  ;;  %v32_v7 = vld [vmem:[%s566_s2 + $0x18] sm:$0xff]  ;;  %vm42_vm2 = vcmask 474112   ;;  %s429_s29 = smov 20   ;;  %v223_v35 = vstv %s570_s6 }
   0x6   :  { %360 = vmatpush3.msra.mxu0 %v34_v3  ;;  %377 = vmatpush3.msra.mxu1 %v124_v5  ;;  %v31_v8 = vld [vmem:[%s566_s2 + $0x10] sm:$0xff]  ;;  %v30_v9 = vld [vmem:[%s566_s2 + $0x8] sm:$0xff]  ;;  %v29_v10 = vld [vmem:[%s566_s2] sm:$0xff]  ;;  %vm131_vm3 = vcmask 326656   ;;  %vm228_vm4 = vcmask 1043456   ;;  %s430_s15 = smov 108  }
   0x7   :  { %361 = vmatprep.subr.mxu0 %v427_v1  ;;  %378 = vmatprep.subr.mxu1 %v427_v1  ;;  %v28_v11 = vld [vmem:[%s564_s0] sm:$0xff]  ;;  %v123_v12 = vld [vmem:[%s567_s3 + $0x10] sm:$0xff]  ;;  %v122_v13 = vld [vmem:[%s567_s3 + $0x8] sm:$0xff]  ;;  %vm224_vm5 = vcmask 162816   ;;  %vm310_vm6 = vcmask 490496   ;;  %s433_s18 = smov [#allocation3]  }
   0x8   :  { %362 = vmatpush3.msra.mxu0 %v33_v6  ;;  %379 = vmatpush3.msra.mxu1 %v123_v12  ;;  %v121_v14 = vld [vmem:[%s567_s3] sm:$0xff]  ;;  %v221_v21 = vld [vmem:[%s569_s5 + $0x10] sm:$0xf]  ;;  %v220_v22 = vld [vmem:[%s569_s5 + $0x8] sm:$0xff]  ;;  %s321_s19 = sshll.u32 %s433_s18, 4  ;;  %vm312_vm7 = vcmask 498688   ;;  %s322_s19 = int_to_ptr.vmem [resolvable:$true] %s321_s19 }
   0x9   :  { %363 = vmatprep.subr.mxu0 %v427_v1  ;;  %380 = vmatprep.subr.mxu1 %v427_v1  ;;  %v208_v15 = vld [vmem:[%s565_s1] sm:$0xff]  ;;  %s405_s20 = scalar_lea.vmem %s322_s19, 128  ;;  %p410_p1 = scmp.lt.s32.totalorder %s322_s19, %s322_s19 }
   0xa   :  { %364 = vmatpush3.msra.mxu0 %v32_v7  ;;  %381 = vmatpush3.msra.mxu1 %v122_v13  ;;  %v329_v16 = vld [vmem:[%s568_s4] ss:$0 sm:$0xff]  ;;  %v332_v23 = vld [vmem:[%s568_s4 + $0x1] ss:$0 sm:$0xff]  ;;  %s431_s4 = smov 40   ;;  %p406_p0 = scmp.ne.s32.totalorder %s322_s19, %s405_s20 }
   0xb   :  { %365 = vmatprep.subr.mxu0 %v427_v1  ;;  %382 = vmatprep.subr.mxu1 %v427_v1  ;;  %v219_v29 = vld [vmem:[%s569_s5] sm:$0xff]  ;;  %s432_s5 = smov 60   ;;  %p411_p2 = scmp.lt.s32.totalorder %s405_s20, %s405_s20 }
   0xc   :  { %366 = vmatpush3.msra.mxu0 %v31_v8  ;;  %383 = vmatpush3.msra.mxu1 %v121_v14 }
   0xd   :  { %367 = vmatprep.subr.mxu0 %v427_v1  ;;  %387 = vmatprep.subr.mxu1 %v427_v1  ;;  %p412_p3 = por %p411_p2, %p410_p1 }
   0xe   :  { %368 = vmatpush3.msra.mxu0 %v30_v9  ;;  %210 = vrot.lane.b32.xlu0 %v208_v15, %s429_s29 }
   0xf   :  { %369 = vmatprep.subr.mxu0 %v427_v1  ;;  %p413_p4 = pnand %p412_p3, %p406_p0 }
  0x10   :  { %370 = vmatpush3.msra.mxu0 %v29_v10 }
  0x11   :  { %372 = vmatmul.mubr.msk.f32.vlgmr.msra.gmra.mxu0 %vm42_vm2, %v28_v11 }
  0x80   :  { %v211_v30 = vpop.permute.xlu0 %210 }
  0xd1   :  { %v116_v17 = vpop.f32.mrf.mxu0 }
  0xd2   :  { %v117_v18 = vadd.f32 %v329_v16, %v116_v17 }
  0xd3   :  { %v373_v19 = vpop.f32.mrf.mxu0 }
  0xd4   :  { %v120_v20 = vmax.f32 %v117_v18, 0.0 }
  0xd6   :  { %385 = vmatmul.mubr.msk.f32.vlgmr.msra.gmra.mxu1 %vm131_vm3, %v120_v20 }
  0xd7   :  { %393 = vmatprep.mubr.msk.f32.mxu1 %vm428_vm1, %v427_v1  ;;  %388 = vmatpush3.msk.msra.mxu1 %vm228_vm4, %v221_v21 }
  0xd8   :  { %389 = vmatprep.subr.mxu1 %v427_v1 }
  0xd9   :  { %390 = vmatpush3.msra.mxu1 %v220_v22 }
  0xda   :  { %391 = vmatprep.subr.mxu1 %v427_v1 }
  0xdb   :  { %392 = vmatpush3.msra.mxu1 %v219_v29 }
 0x196   :  { %v201_v24 = vpop.f32.mrf.mxu1 }
 0x197   :  { %v202_v25 = vadd.f32 %v332_v23, %v201_v24 }
 0x198   :  { %v386_v26 = vpop.f32.mrf.mxu1 }
 0x199   :  { %v205_v27 = vmul.f32 0.5, %v202_v25 }
 0x19b   :  { %v206_v28 = vmul.f32 1.442695, %v205_v27 }
 0x19d   :  { %403 = vpow2.f32 %v206_v28 }
 0x1aa   :  { %v404_v31 = vpop.eup %403 }
 0x1ab   :  { %v213_v32 = vmul.f32 %v404_v31, %v211_v30 }
 0x1ad   :  { %215 = vrot.lane.b32.xlu0 %v213_v32, %s430_s15 }
 0x21f   :  { %v216_v33 = vpop.permute.xlu0 %215 }
 0x220   :  { %v218_v34 = vadd.f32 %v216_v33, %v202_v25 }
 0x222   :  { %302 = vrot.lane.b32.xlu1 %v218_v34, %s431_s4  ;;  %394 = vmatmul.mubr.msk.f32.vlgmr.msra.gmra.mxu1 %vm224_vm5, %v218_v34 }
 0x294   :  { %v303_v39 = vpop.permute.xlu1 %302 }
 0x295   :  { %v309_v40 = vsel %vm131_vm3, %v202_v25, %v303_v39 }
 0x2e2   :  { %v298_v36 = vpop.f32.mrf.mxu1 }
 0x2e3   :  { %v299_v37 = vadd.f32 %v298_v36, %v223_v35 }
 0x2e4   :  { %v395_v38 = vpop.f32.mrf.mxu1 }
 0x2e5   :  { %306 = vrot.lane.b32.xlu1 %v299_v37, %s432_s5 }
 0x357   :  { %v307_v41 = vpop.permute.xlu1 %306 }
 0x358   :  { %v311_v42 = vsel %vm310_vm6, %v309_v40, %v307_v41 }
 0x359   :  { %v313_v43 = vsel %vm312_vm7, %v311_v42, 0.0 }
 0x35a   :  { %314 = vst [vmem:[#allocation3] sm:$0xff] %v313_v43 }
 0x35b   :  { %416 = shalt.err (!%p413_p4)
}
 0x35c   :  { %324 = dma.vmem_to_hbm [thread:$0]  %s322_s19, 128, %s571_s7, [#allocation4]  }
 0x35d   :  { %425 = dma.done.wait [#allocation4], 128  }
 0x35e   :  { %426 = vsyncadd [#allocation4], 4294967168 }
 0x35f   :  { %328 = vsyncpa [#allocation4], 1 }

</bundles_post_ra>
